<compile_context>
chip_gen: v7x
topology: tpu7x:2x2x1
jax: 0.10.0
libtpu: 0.0.40
codegen_flags: <defaults>
</compile_context>

<pallas_src>
import functools

import jax
import jax.numpy as jnp
from jax.experimental import pallas as pl
from jax.experimental.pallas import tpu as pltpu


def gru_kernel(gi_ref, whh_ref, bhn_ref, h0_ref, out_ref, h_scr, *,
               unroll, gate_dtype):
    """One grid step == chunk_t GRU timesteps for one batch block.

    gi_ref : (chunk_t, B_BLK, 3*Hp)  precomputed input projection (+ folded biases),
                                     stored in weight_dtype (bf16 by default)
    whh_ref: (Hp, 3*Hp)              W_hh^T, gate bands at 128-aligned columns
    bhn_ref: (1, Hp)                 b_hh of the 'n' gate (must stay inside r*(.))
    h0_ref : (B_BLK, Hp)             initial hidden state
    out_ref: (B_BLK, Hp)             final hidden state (written on last chunk)
    h_scr  : (B_BLK, Hp) f32         VMEM hidden-state carry across time chunks
    """
    c = pl.program_id(1)
    f32 = jnp.float32

    @pl.when(c == 0)
    def _():
        h_scr[...] = h0_ref[...].astype(f32)

    Hp = h_scr.shape[-1]
    chunk_t = gi_ref.shape[0]

    whh = whh_ref[...]                                           # (Hp, 3Hp), bf16/f32
    # Hoist the bias broadcast out of the time loop (JAX does not CSE it).
    bhn = jnp.broadcast_to(bhn_ref[...].astype(f32), h_scr.shape)

    def step(tt, h):
        # The only matmul on the serial critical path; bf16 weights, f32 accumulate.
        gh = jnp.dot(h.astype(whh.dtype), whh, preferred_element_type=f32)
        # Consume gate bands r -> z -> n; each gi band is loaded from the ref right
        # before use so the full (B_BLK, 3Hp) gi tile is never live alongside gh.
        r = jax.nn.sigmoid((gi_ref[tt, :, 0 * Hp:1 * Hp].astype(f32)
                            + gh[:, 0 * Hp:1 * Hp]).astype(gate_dtype)).astype(f32)
        z = jax.nn.sigmoid((gi_ref[tt, :, 1 * Hp:2 * Hp].astype(f32)
                            + gh[:, 1 * Hp:2 * Hp]).astype(gate_dtype)).astype(f32)
        n = jnp.tanh((gi_ref[tt, :, 2 * Hp:3 * Hp].astype(f32)
                      + r * (gh[:, 2 * Hp:3 * Hp] + bhn)).astype(gate_dtype)).astype(f32)
        return n + z * (h - n)                                   # == (1-z)*n + z*h

    h = jax.lax.fori_loop(0, chunk_t, step, h_scr[...], unroll=unroll)
    h_scr[...] = h

    @pl.when(c == pl.num_programs(1) - 1)
    def _():
        out_ref[...] = h.astype(out_ref.dtype)


def gru_forward(x, w_ih, w_hh, b_ih, b_hh, h0, *, chunk_t=16,
                weight_dtype=jnp.bfloat16, gate_dtype=jnp.float32):
    """x: (B, T, Din); w_ih: (3H, Din); w_hh: (3H, H); b_*: (3H,); h0: (B, H).
    Returns output[:, -1, :] of the PyTorch GRU, i.e. the final hidden state (B, H).

    weight_dtype: dtype of W_hh and of the streamed gi (bf16 default, f32 for exact
                  validation).  gate_dtype: dtype of sigmoid/tanh pre-activations
                  (set to bf16 on v6e/v7x for 2x EUP throughput; keep f32 on v5e).
    """
    B, T, Din = x.shape
    H = w_hh.shape[1]
    assert T >= 1, "T=0 would leave the output unwritten"
    f32 = jnp.float32

    LANES, SUBLANES = 128, 8
    Hp = -(-H // LANES) * LANES                        # lane-dense per-gate band width
    Bp = -(-B // SUBLANES) * SUBLANES                  # fill sublanes
    # 256-row blocks fill v6e/v7x MXU tiles for big batches; 128 (or less) otherwise.
    B_BLK = 256 if Bp >= 256 else min(Bp, 128)
    Bp = -(-Bp // B_BLK) * B_BLK

    # ---- repack weights/biases into lane-dense per-gate bands (PyTorch order r,z,n) ----
    w_ih_g = w_ih.reshape(3, H, Din)
    w_hh_g = w_hh.reshape(3, H, H)
    b_ih_g = b_ih.reshape(3, H)
    b_hh_g = b_hh.reshape(3, H)

    wih_T = jnp.zeros((Din, 3 * Hp), f32)
    whh_T = jnp.zeros((Hp, 3 * Hp), f32)
    for g in range(3):
        wih_T = wih_T.at[:, g * Hp:g * Hp + H].set(w_ih_g[g].T.astype(f32))
        whh_T = whh_T.at[:H, g * Hp:g * Hp + H].set(w_hh_g[g].T.astype(f32))

    # Fold b_ih (all gates) + b_hh_r + b_hh_z into gi; keep b_hh_n (sits inside r*(.)).
    b_comb = jnp.zeros((1, 3 * Hp), f32)
    b_comb = b_comb.at[0, 0 * Hp:0 * Hp + H].set((b_ih_g[0] + b_hh_g[0]).astype(f32))
    b_comb = b_comb.at[0, 1 * Hp:1 * Hp + H].set((b_ih_g[1] + b_hh_g[1]).astype(f32))
    b_comb = b_comb.at[0, 2 * Hp:2 * Hp + H].set(b_ih_g[2].astype(f32))
    bhn = jnp.zeros((1, Hp), f32).at[0, :H].set(b_hh_g[2].astype(f32))

    chunk_t = max(1, min(chunk_t, T))
    n_chunks = -(-T // chunk_t)
    Tp = n_chunks * chunk_t

    # ---- time-parallel input projection, built directly in time-major layout ----
    # Transpose/pad while the tensor is still the small (T, B, Din) one, then do ONE
    # big (Tp*Bp, Din) x (Din, 3Hp) matmul -> no extra HBM pass over the big gi.
    xt = jnp.transpose(x, (1, 0, 2)).astype(f32)                 # (T, B, Din)
    xt = jnp.pad(xt, ((0, Tp - T), (0, Bp - B), (0, 0)))         # (Tp, Bp, Din)
    gi = xt.reshape(Tp * Bp, Din) @ wih_T + b_comb               # (Tp*Bp, 3Hp)
    gi = gi.reshape(Tp, Bp, 3 * Hp)
    if Tp > T:
        # Padded timesteps: force z -> 1 so h passes through unchanged
        # (1e4 survives the bf16 cast and dominates any gh_z).
        gi = gi.at[T:, :, Hp:2 * Hp].set(1e4)
    gi = gi.astype(weight_dtype)                                 # bf16 stream by default

    h0p = jnp.zeros((Bp, Hp), f32).at[:B, :H].set(h0.astype(f32))

    # Bounded unroll: amortize loop overhead without exploding vreg live ranges.
    if chunk_t <= 8:
        unroll = chunk_t
    elif chunk_t % 4 == 0:
        unroll = 4
    else:
        unroll = 2 if chunk_t % 2 == 0 else 1

    # Explicit VMEM budget (double-buffered gi + W_hh, plus small resident tiles),
    # capped at 64 MiB so the same configuration fits v7x's per-core VMEM.
    gbytes = jnp.dtype(weight_dtype).itemsize
    vmem_budget = (2 * chunk_t * B_BLK * 3 * Hp * gbytes
                   + 2 * Hp * 3 * Hp * gbytes
                   + 6 * B_BLK * Hp * 4 + 4 * Hp * 4
                   + (4 << 20))
    vmem_limit = int(min(max(vmem_budget, 32 << 20), 64 << 20))

    kern = functools.partial(gru_kernel, unroll=unroll, gate_dtype=gate_dtype)

    out_pad = pl.pallas_call(
        kern,
        out_shape=jax.ShapeDtypeStruct((Bp, Hp), x.dtype),
        grid_spec=pltpu.PrefetchScalarGridSpec(
            num_scalar_prefetch=0,
            grid=(Bp // B_BLK, n_chunks),                        # (batch blocks, time chunks)
            in_specs=[
                pl.BlockSpec((chunk_t, B_BLK, 3 * Hp), lambda b, c: (c, b, 0)),  # gi chunk
                pl.BlockSpec((Hp, 3 * Hp), lambda b, c: (0, 0)),                 # W_hh^T
                pl.BlockSpec((1, Hp), lambda b, c: (0, 0)),                      # b_hh_n
                pl.BlockSpec((B_BLK, Hp), lambda b, c: (b, 0)),                  # h0 block
            ],
            out_specs=pl.BlockSpec((B_BLK, Hp), lambda b, c: (b, 0)),            # resident h
            scratch_shapes=[pltpu.VMEM((B_BLK, Hp), jnp.float32)],
        ),
        compiler_params=pltpu.CompilerParams(
            # batch blocks are independent (megacore); time chunks are the recurrence
            dimension_semantics=("parallel", "arbitrary"),
            vmem_limit_bytes=vmem_limit),
    )(gi, whh_T.astype(weight_dtype), bhn, h0p)

    return out_pad[:B, :H]


def gru_reference(x, w_ih, w_hh, b_ih, b_hh, h0):
    """Pure-JAX reference (PyTorch nn.GRU equations, gate order r,z,n)."""
    H = w_hh.shape[1]

    def step(h, x_t):
        gi = x_t @ w_ih.T + b_ih
        gh = h @ w_hh.T + b_hh
        i_r, i_z, i_n = gi[:, :H], gi[:, H:2 * H], gi[:, 2 * H:]
        h_r, h_z, h_n = gh[:, :H], gh[:, H:2 * H], gh[:, 2 * H:]
        r = jax.nn.sigmoid(i_r + h_r)
        z = jax.nn.sigmoid(i_z + h_z)
        n = jnp.tanh(i_n + r * h_n)
        h_new = (1.0 - z) * n + z * h
        return h_new, None

    h_last, _ = jax.lax.scan(step, h0, jnp.transpose(x, (1, 0, 2)))
    return h_last


if __name__ == "__main__":
    B, T, D_in, H = 2, 8, 16, 32

    key = jax.random.PRNGKey(0)
    kx, kh0, k1, k2, k3, k4 = jax.random.split(key, 6)

    # Deterministic "parameters" matching nn.GRU(n_input=D_in, n_outputs=H, 1):
    # uniform(-1/sqrt(H), 1/sqrt(H)), shapes (3H, D_in), (3H, H), (3H,), (3H,).
    bound = 1.0 / jnp.sqrt(jnp.float32(H))
    w_ih = jax.random.uniform(k1, (3 * H, D_in), jnp.float32, -bound, bound)
    w_hh = jax.random.uniform(k2, (3 * H, H), jnp.float32, -bound, bound)
    b_ih = jax.random.uniform(k3, (3 * H,), jnp.float32, -bound, bound)
    b_hh = jax.random.uniform(k4, (3 * H,), jnp.float32, -bound, bound)

    x = jax.random.normal(kx, (B, T, D_in), jnp.float32)
    # torch.randn(1, B, H) initial hidden state -> deterministic normal here.
    h0 = jax.random.normal(kh0, (B, H), jnp.float32)

    ref = gru_reference(x, w_ih, w_hh, b_ih, b_hh, h0)

    # 1) f32 validation path; chunk_t=4 exercises the hidden-state carry across chunks.
    out_f32 = gru_forward(x, w_ih, w_hh, b_ih, b_hh, h0, chunk_t=4,
                          weight_dtype=jnp.float32)
    out_f32 = jax.block_until_ready(out_f32)
    assert out_f32.shape == (B, H)
    assert jnp.allclose(out_f32, ref, atol=2e-5, rtol=2e-5), "f32 path mismatch"

    # 2) Default fast path: bf16 W_hh + bf16 streamed gi, f32 accumulation.
    out_fast = gru_forward(x, w_ih, w_hh, b_ih, b_hh, h0)
    out_fast = jax.block_until_ready(out_fast)
    assert out_fast.shape == (B, H)
    assert jnp.allclose(out_fast, ref, atol=5e-2, rtol=5e-2), "bf16 path mismatch"

    print("KERNEL_OK")
</pallas_src>

<mosaic_0001>
module attributes {stable_mosaic.version = 11 : i64} {
  func.func @gru_kernel(%arg0: i32, %arg1: i32, %arg2: memref<4x8x384xf32, #tpu.memory_space<vmem>>, %arg3: memref<128x384xf32, #tpu.memory_space<vmem>>, %arg4: memref<1x128xf32, #tpu.memory_space<vmem>>, %arg5: memref<8x128xf32, #tpu.memory_space<vmem>>, %arg6: memref<8x128xf32, #tpu.memory_space<vmem>>, %arg7: memref<8x128xf32, #tpu.memory_space<vmem>>) attributes {dimension_semantics = [#tpu.dimension_semantics<parallel>, #tpu.dimension_semantics<arbitrary>], iteration_bounds = array<i64: 1, 2>, scalar_prefetch = 0 : i64, scratch_operands = 1 : i64, tpu.core_type = #tpu.core_type<tc>, window_params = [{transform_indices = @transform_0, window_bounds = array<i64: 4, 8, 384>}, {pipeline_mode = #tpu.pipeline_mode<synchronous>, transform_indices = @transform_1, window_bounds = array<i64: 128, 384>}, {pipeline_mode = #tpu.pipeline_mode<synchronous>, transform_indices = @transform_2, window_bounds = array<i64: 1, 128>}, {transform_indices = @transform_3, window_bounds = array<i64: 8, 128>}, {transform_indices = @transform_4, window_bounds = array<i64: 8, 128>}]} {
    %c0_i32 = arith.constant 0 : i32
    %0 = arith.cmpi eq, %arg1, %c0_i32 : i32
    %1 = arith.extui %0 : i1 to i32
    %c0_i32_0 = arith.constant 0 : i32
    %2 = arith.cmpi ne, %1, %c0_i32_0 : i32
    scf.if %2 {
      %c0_44 = arith.constant 0 : index
      %c0_45 = arith.constant 0 : index
      %140 = vector.load %arg5[%c0_44, %c0_45] : memref<8x128xf32, #tpu.memory_space<vmem>>, vector<8x128xf32>
      %c0_46 = arith.constant 0 : index
      %c0_47 = arith.constant 0 : index
      %141 = vector.load %arg7[%c0_46, %c0_47] : memref<8x128xf32, #tpu.memory_space<vmem>>, vector<8x128xf32>
      tpu.vector_store %arg7[%c0_46, %c0_47], %140 {strides = array<i32>} : memref<8x128xf32, #tpu.memory_space<vmem>>, vector<8x128xf32>,
    } else {
    }
    %c0 = arith.constant 0 : index
    %c0_1 = arith.constant 0 : index
    %3 = vector.load %arg3[%c0, %c0_1] : memref<128x384xf32, #tpu.memory_space<vmem>>, vector<128x384xf32>
    %c0_2 = arith.constant 0 : index
    %c0_3 = arith.constant 0 : index
    %4 = vector.load %arg4[%c0_2, %c0_3] : memref<1x128xf32, #tpu.memory_space<vmem>>, vector<1x128xf32>
    %5 = vector.shape_cast %4 : vector<1x128xf32> to vector<1x128xf32>
    %6 = vector.broadcast %5 : vector<1x128xf32> to vector<8x128xf32>
    %c0_4 = arith.constant 0 : index
    %c0_5 = arith.constant 0 : index
    %7 = vector.load %arg7[%c0_4, %c0_5] : memref<8x128xf32, #tpu.memory_space<vmem>>, vector<8x128xf32>
    %c0_i32_6 = arith.constant 0 : i32
    %cst = arith.constant dense<0.000000e+00> : vector<8x384xf32>
    %8 = tpu.matmul %7, %3, %cst {dimension_numbers = #tpu.dot_dimension_numbers<[1], [0], [0], [1], [0, 0, 1, 1], [], []>} : vector<8x128xf32>, vector<128x384xf32>, vector<8x384xf32> -> vector<8x384xf32>
    %9 = arith.index_cast %c0_i32_6 : i32 to index
    %c0_7 = arith.constant 0 : index
    %c0_8 = arith.constant 0 : index
    %10 = vector.load %arg2[%9, %c0_7, %c0_8] : memref<4x8x384xf32, #tpu.memory_space<vmem>>, vector<1x8x128xf32>
    %11 = vector.shape_cast %10 : vector<1x8x128xf32> to vector<8x128xf32>
    %12 = vector.extract_strided_slice %8 {offsets = [0, 0], sizes = [8, 128], strides = [1, 1]} : vector<8x384xf32> to vector<8x128xf32>
    %13 = arith.addf %11, %12 : vector<8x128xf32>
    %14 = arith.negf %13 : vector<8x128xf32>
    %15 = math.exp %14 : vector<8x128xf32>
    %cst_9 = arith.constant 1.000000e+00 : f32
    %16 = vector.broadcast %cst_9 : f32 to vector<8x128xf32>
    %17 = arith.addf %16, %15 : vector<8x128xf32>
    %18 = arith.divf %16, %17 : vector<8x128xf32>
    %19 = arith.index_cast %c0_i32_6 : i32 to index
    %c0_10 = arith.constant 0 : index
    %c128 = arith.constant 128 : index
    %20 = vector.load %arg2[%19, %c0_10, %c128] : memref<4x8x384xf32, #tpu.memory_space<vmem>>, vector<1x8x128xf32>
    %21 = vector.shape_cast %20 : vector<1x8x128xf32> to vector<8x128xf32>
    %22 = vector.extract_strided_slice %8 {offsets = [0, 128], sizes = [8, 128], strides = [1, 1]} : vector<8x384xf32> to vector<8x128xf32>
    %23 = arith.addf %21, %22 : vector<8x128xf32>
    %24 = arith.negf %23 : vector<8x128xf32>
    %25 = math.exp %24 : vector<8x128xf32>
    %cst_11 = arith.constant 1.000000e+00 : f32
    %26 = vector.broadcast %cst_11 : f32 to vector<8x128xf32>
    %27 = arith.addf %26, %25 : vector<8x128xf32>
    %28 = arith.divf %26, %27 : vector<8x128xf32>
    %29 = arith.index_cast %c0_i32_6 : i32 to index
    %c0_12 = arith.constant 0 : index
    %c256 = arith.constant 256 : index
    %30 = vector.load %arg2[%29, %c0_12, %c256] : memref<4x8x384xf32, #tpu.memory_space<vmem>>, vector<1x8x128xf32>
    %31 = vector.shape_cast %30 : vector<1x8x128xf32> to vector<8x128xf32>
    %32 = vector.extract_strided_slice %8 {offsets = [0, 256], sizes = [8, 128], strides = [1, 1]} : vector<8x384xf32> to vector<8x128xf32>
    %33 = arith.addf %32, %6 : vector<8x128xf32>
    %34 = arith.mulf %18, %33 : vector<8x128xf32>
    %35 = arith.addf %31, %34 : vector<8x128xf32>
    %36 = math.tanh %35 : vector<8x128xf32>
    %37 = arith.subf %7, %36 : vector<8x128xf32>
    %38 = arith.mulf %28, %37 : vector<8x128xf32>
    %39 = arith.addf %36, %38 : vector<8x128xf32>
    %c1_i32 = arith.constant 1 : i32
    %cst_13 = arith.constant dense<0.000000e+00> : vector<8x384xf32>
    %40 = tpu.matmul %39, %3, %cst_13 {dimension_numbers = #tpu.dot_dimension_numbers<[1], [0], [0], [1], [0, 0, 1, 1], [], []>} : vector<8x128xf32>, vector<128x384xf32>, vector<8x384xf32> -> vector<8x384xf32>
    %41 = arith.index_cast %c1_i32 : i32 to index
    %c0_14 = arith.constant 0 : index
    %c0_15 = arith.constant 0 : index
    %42 = vector.load %arg2[%41, %c0_14, %c0_15] : memref<4x8x384xf32, #tpu.memory_space<vmem>>, vector<1x8x128xf32>
    %43 = vector.shape_cast %42 : vector<1x8x128xf32> to vector<8x128xf32>
    %44 = vector.extract_strided_slice %40 {offsets = [0, 0], sizes = [8, 128], strides = [1, 1]} : vector<8x384xf32> to vector<8x128xf32>
    %45 = arith.addf %43, %44 : vector<8x128xf32>
    %46 = arith.negf %45 : vector<8x128xf32>
    %47 = math.exp %46 : vector<8x128xf32>
    %cst_16 = arith.constant 1.000000e+00 : f32
    %48 = vector.broadcast %cst_16 : f32 to vector<8x128xf32>
    %49 = arith.addf %48, %47 : vector<8x128xf32>
    %50 = arith.divf %48, %49 : vector<8x128xf32>
    %51 = arith.index_cast %c1_i32 : i32 to index
    %c0_17 = arith.constant 0 : index
    %c128_18 = arith.constant 128 : index
    %52 = vector.load %arg2[%51, %c0_17, %c128_18] : memref<4x8x384xf32, #tpu.memory_space<vmem>>, vector<1x8x128xf32>
    %53 = vector.shape_cast %52 : vector<1x8x128xf32> to vector<8x128xf32>
    %54 = vector.extract_strided_slice %40 {offsets = [0, 128], sizes = [8, 128], strides = [1, 1]} : vector<8x384xf32> to vector<8x128xf32>
    %55 = arith.addf %53, %54 : vector<8x128xf32>
    %56 = arith.negf %55 : vector<8x128xf32>
    %57 = math.exp %56 : vector<8x128xf32>
    %cst_19 = arith.constant 1.000000e+00 : f32
    %58 = vector.broadcast %cst_19 : f32 to vector<8x128xf32>
    %59 = arith.addf %58, %57 : vector<8x128xf32>
    %60 = arith.divf %58, %59 : vector<8x128xf32>
    %61 = arith.index_cast %c1_i32 : i32 to index
    %c0_20 = arith.constant 0 : index
    %c256_21 = arith.constant 256 : index
    %62 = vector.load %arg2[%61, %c0_20, %c256_21] : memref<4x8x384xf32, #tpu.memory_space<vmem>>, vector<1x8x128xf32>
    %63 = vector.shape_cast %62 : vector<1x8x128xf32> to vector<8x128xf32>
    %64 = vector.extract_strided_slice %40 {offsets = [0, 256], sizes = [8, 128], strides = [1, 1]} : vector<8x384xf32> to vector<8x128xf32>
    %65 = arith.addf %64, %6 : vector<8x128xf32>
    %66 = arith.mulf %50, %65 : vector<8x128xf32>
    %67 = arith.addf %63, %66 : vector<8x128xf32>
    %68 = math.tanh %67 : vector<8x128xf32>
    %69 = arith.subf %39, %68 : vector<8x128xf32>
    %70 = arith.mulf %60, %69 : vector<8x128xf32>
    %71 = arith.addf %68, %70 : vector<8x128xf32>
    %c2_i32 = arith.constant 2 : i32
    %cst_22 = arith.constant dense<0.000000e+00> : vector<8x384xf32>
    %72 = tpu.matmul %71, %3, %cst_22 {dimension_numbers = #tpu.dot_dimension_numbers<[1], [0], [0], [1], [0, 0, 1, 1], [], []>} : vector<8x128xf32>, vector<128x384xf32>, vector<8x384xf32> -> vector<8x384xf32>
    %73 = arith.index_cast %c2_i32 : i32 to index
    %c0_23 = arith.constant 0 : index
    %c0_24 = arith.constant 0 : index
    %74 = vector.load %arg2[%73, %c0_23, %c0_24] : memref<4x8x384xf32, #tpu.memory_space<vmem>>, vector<1x8x128xf32>
    %75 = vector.shape_cast %74 : vector<1x8x128xf32> to vector<8x128xf32>
    %76 = vector.extract_strided_slice %72 {offsets = [0, 0], sizes = [8, 128], strides = [1, 1]} : vector<8x384xf32> to vector<8x128xf32>
    %77 = arith.addf %75, %76 : vector<8x128xf32>
    %78 = arith.negf %77 : vector<8x128xf32>
    %79 = math.exp %78 : vector<8x128xf32>
    %cst_25 = arith.constant 1.000000e+00 : f32
    %80 = vector.broadcast %cst_25 : f32 to vector<8x128xf32>
    %81 = arith.addf %80, %79 : vector<8x128xf32>
    %82 = arith.divf %80, %81 : vector<8x128xf32>
    %83 = arith.index_cast %c2_i32 : i32 to index
    %c0_26 = arith.constant 0 : index
    %c128_27 = arith.constant 128 : index
    %84 = vector.load %arg2[%83, %c0_26, %c128_27] : memref<4x8x384xf32, #tpu.memory_space<vmem>>, vector<1x8x128xf32>
    %85 = vector.shape_cast %84 : vector<1x8x128xf32> to vector<8x128xf32>
    %86 = vector.extract_strided_slice %72 {offsets = [0, 128], sizes = [8, 128], strides = [1, 1]} : vector<8x384xf32> to vector<8x128xf32>
    %87 = arith.addf %85, %86 : vector<8x128xf32>
    %88 = arith.negf %87 : vector<8x128xf32>
    %89 = math.exp %88 : vector<8x128xf32>
    %cst_28 = arith.constant 1.000000e+00 : f32
    %90 = vector.broadcast %cst_28 : f32 to vector<8x128xf32>
    %91 = arith.addf %90, %89 : vector<8x128xf32>
    %92 = arith.divf %90, %91 : vector<8x128xf32>
    %93 = arith.index_cast %c2_i32 : i32 to index
    %c0_29 = arith.constant 0 : index
    %c256_30 = arith.constant 256 : index
    %94 = vector.load %arg2[%93, %c0_29, %c256_30] : memref<4x8x384xf32, #tpu.memory_space<vmem>>, vector<1x8x128xf32>
    %95 = vector.shape_cast %94 : vector<1x8x128xf32> to vector<8x128xf32>
    %96 = vector.extract_strided_slice %72 {offsets = [0, 256], sizes = [8, 128], strides = [1, 1]} : vector<8x384xf32> to vector<8x128xf32>
    %97 = arith.addf %96, %6 : vector<8x128xf32>
    %98 = arith.mulf %82, %97 : vector<8x128xf32>
    %99 = arith.addf %95, %98 : vector<8x128xf32>
    %100 = math.tanh %99 : vector<8x128xf32>
    %101 = arith.subf %71, %100 : vector<8x128xf32>
    %102 = arith.mulf %92, %101 : vector<8x128xf32>
    %103 = arith.addf %100, %102 : vector<8x128xf32>
    %c3_i32 = arith.constant 3 : i32
    %cst_31 = arith.constant dense<0.000000e+00> : vector<8x384xf32>
    %104 = tpu.matmul %103, %3, %cst_31 {dimension_numbers = #tpu.dot_dimension_numbers<[1], [0], [0], [1], [0, 0, 1, 1], [], []>} : vector<8x128xf32>, vector<128x384xf32>, vector<8x384xf32> -> vector<8x384xf32>
    %105 = arith.index_cast %c3_i32 : i32 to index
    %c0_32 = arith.constant 0 : index
    %c0_33 = arith.constant 0 : index
    %106 = vector.load %arg2[%105, %c0_32, %c0_33] : memref<4x8x384xf32, #tpu.memory_space<vmem>>, vector<1x8x128xf32>
    %107 = vector.shape_cast %106 : vector<1x8x128xf32> to vector<8x128xf32>
    %108 = vector.extract_strided_slice %104 {offsets = [0, 0], sizes = [8, 128], strides = [1, 1]} : vector<8x384xf32> to vector<8x128xf32>
    %109 = arith.addf %107, %108 : vector<8x128xf32>
    %110 = arith.negf %109 : vector<8x128xf32>
    %111 = math.exp %110 : vector<8x128xf32>
    %cst_34 = arith.constant 1.000000e+00 : f32
    %112 = vector.broadcast %cst_34 : f32 to vector<8x128xf32>
    %113 = arith.addf %112, %111 : vector<8x128xf32>
    %114 = arith.divf %112, %113 : vector<8x128xf32>
    %115 = arith.index_cast %c3_i32 : i32 to index
    %c0_35 = arith.constant 0 : index
    %c128_36 = arith.constant 128 : index
    %116 = vector.load %arg2[%115, %c0_35, %c128_36] : memref<4x8x384xf32, #tpu.memory_space<vmem>>, vector<1x8x128xf32>
    %117 = vector.shape_cast %116 : vector<1x8x128xf32> to vector<8x128xf32>
    %118 = vector.extract_strided_slice %104 {offsets = [0, 128], sizes = [8, 128], strides = [1, 1]} : vector<8x384xf32> to vector<8x128xf32>
    %119 = arith.addf %117, %118 : vector<8x128xf32>
    %120 = arith.negf %119 : vector<8x128xf32>
    %121 = math.exp %120 : vector<8x128xf32>
    %cst_37 = arith.constant 1.000000e+00 : f32
    %122 = vector.broadcast %cst_37 : f32 to vector<8x128xf32>
    %123 = arith.addf %122, %121 : vector<8x128xf32>
    %124 = arith.divf %122, %123 : vector<8x128xf32>
    %125 = arith.index_cast %c3_i32 : i32 to index
    %c0_38 = arith.constant 0 : index
    %c256_39 = arith.constant 256 : index
    %126 = vector.load %arg2[%125, %c0_38, %c256_39] : memref<4x8x384xf32, #tpu.memory_space<vmem>>, vector<1x8x128xf32>
    %127 = vector.shape_cast %126 : vector<1x8x128xf32> to vector<8x128xf32>
    %128 = vector.extract_strided_slice %104 {offsets = [0, 256], sizes = [8, 128], strides = [1, 1]} : vector<8x384xf32> to vector<8x128xf32>
    %129 = arith.addf %128, %6 : vector<8x128xf32>
    %130 = arith.mulf %114, %129 : vector<8x128xf32>
    %131 = arith.addf %127, %130 : vector<8x128xf32>
    %132 = math.tanh %131 : vector<8x128xf32>
    %133 = arith.subf %103, %132 : vector<8x128xf32>
    %134 = arith.mulf %124, %133 : vector<8x128xf32>
    %135 = arith.addf %132, %134 : vector<8x128xf32>
    %c4_i32 = arith.constant 4 : i32
    %c0_40 = arith.constant 0 : index
    %c0_41 = arith.constant 0 : index
    %136 = vector.load %arg7[%c0_40, %c0_41] : memref<8x128xf32, #tpu.memory_space<vmem>>, vector<8x128xf32>
    tpu.vector_store %arg7[%c0_40, %c0_41], %135 {strides = array<i32>} : memref<8x128xf32, #tpu.memory_space<vmem>>, vector<8x128xf32>,
    %c1_i32_42 = arith.constant 1 : i32
    %137 = arith.cmpi eq, %arg1, %c1_i32_42 : i32
    %138 = arith.extui %137 : i1 to i32
    %c0_i32_43 = arith.constant 0 : i32
    %139 = arith.cmpi ne, %138, %c0_i32_43 : i32
    scf.if %139 {
      %c0_44 = arith.constant 0 : index
      %c0_45 = arith.constant 0 : index
      %140 = vector.load %arg6[%c0_44, %c0_45] : memref<8x128xf32, #tpu.memory_space<vmem>>, vector<8x128xf32>
      tpu.vector_store %arg6[%c0_44, %c0_45], %135 {strides = array<i32>} : memref<8x128xf32, #tpu.memory_space<vmem>>, vector<8x128xf32>,
    } else {
    }
    return
  }
  func.func @transform_0(%arg0: i32, %arg1: i32) -> (i32, i32, i32) {
    %c0_i32 = arith.constant 0 : i32
    %c0_i32_0 = arith.constant 0 : i32
    return %arg1, %arg0, %c0_i32 : i32, i32, i32
  }
  func.func @transform_1(%arg0: i32, %arg1: i32) -> (i32, i32) {
    %c0_i32 = arith.constant 0 : i32
    %c0_i32_0 = arith.constant 0 : i32
    %c0_i32_1 = arith.constant 0 : i32
    return %c0_i32, %c0_i32_0 : i32, i32
  }
  func.func @transform_2(%arg0: i32, %arg1: i32) -> (i32, i32) {
    %c0_i32 = arith.constant 0 : i32
    %c0_i32_0 = arith.constant 0 : i32
    %c0_i32_1 = arith.constant 0 : i32
    return %c0_i32, %c0_i32_0 : i32, i32
  }
  func.func @transform_3(%arg0: i32, %arg1: i32) -> (i32, i32) {
    %c0_i32 = arith.constant 0 : i32
    %c0_i32_0 = arith.constant 0 : i32
    return %arg0, %c0_i32 : i32, i32
  }
  func.func @transform_4(%arg0: i32, %arg1: i32) -> (i32, i32) {
    %c0_i32 = arith.constant 0 : i32
    %c0_i32_0 = arith.constant 0 : i32
    return %arg0, %c0_i32 : i32, i32
  }
}

</mosaic_0001>

<bundles_post_ra>
// kernel: tpu_custom_call.1
= control target key start
LH: loop header
LB: loop body
LE: loop exit
PB: predicated region body
PF: predicated region fallthrough
CT: control target
= control target key end

     0   :  { %9 = vsyncpa [#allocation4], 0  ;;  %s2272_s0 = inlined_call_operand.hbm [shape: f32[8,8,384], index: 0, kind: input, shape index: {}]   ;;  %s2273_s1 = inlined_call_operand.hbm [shape: f32[128,384], index: 1, kind: input, shape index: {}]   ;;  %s2274_s2 = inlined_call_operand.vmem [shape: f32[1,128], index: 2, kind: input, shape index: {}]   ;;  %s2275_s3 = inlined_call_operand.vmem [shape: f32[8,128], index: 3, kind: input, shape index: {}]   ;;  %s2276_s4 = inlined_call_operand.hbm [shape: f32[8,128], index: 4, kind: output, shape index: {}]  }
   0x1   :  { %11 = vsyncpa [#allocation4 + $0x1], 0 }
   0x2   :  { %12 = vsyncpa [#allocation7], 0 }
   0x3   :  { %13 = vsyncpa [#allocation5], 0  ;;  %s1852_s15 = smov 0   ;;  %s1854_s16 = smov 0  }
   0x4   :  { %s1856_s17 = smov 0   ;;  %s1858_s18 = smov 0  }
   0x5   :  { %s1860_s19 = smov 0   ;;  %s1862_s20 = smov 0  }
   0x6 LB: > { %s1088_s21 = sadd.s32 4294967295, %s1817_s20   ;;  %p53_p0 = scmp.ne.s32.totalorder %s1801_s16, %s1797_s15  ;;  %s1817_s20 = sphi %s1862_s20, %s19_s20   ;;  %s1813_s19 = sphi %s1860_s19, %s2294_s19   ;;  %s1809_s18 = sphi %s1858_s18, %s2293_s18   ;;  %s1805_s17 = sphi %s1856_s17, %s2292_s17   ;;  %s1801_s16 = sphi %s1854_s16, %s2291_s16   ;;  %s1797_s15 = sphi %s1852_s15, %s2290_s15  }
   0x7   : > { %p1884_p1 = scmp.eq.s32.totalorder %s1088_s21, 0  ;;  %p1089_p2 = scmp.ge.s32.totalorder %s1817_s20, 1 }
   0x8   : > { %p158_p3 = scmp.lt.s32.totalorder %s1817_s20, 3  ;;  %s1819_s25 = smov [#allocation6]  }
   0x9   : > { %s2281_s22 = scalar_select %p1884_p1, 1, 0 }
   0xa   : > { %p1892_p4 = por %p1884_p1, %p53_p0  ;;  %p1896_p5 = pnand %p1089_p2, %p158_p3 }
   0xb   : > { %s170_s26 = sshll.u32 %s1819_s25, 4  ;;  %s28_s28 = sadd.s32 1, %s1813_s19  ;;  %s171_s26 = int_to_ptr.vmem [resolvable:$true] %s170_s26 }
   0xc   : > { %s2282_s23 = scalar_select %p1892_p4, 1, 0 }
   0xd   : > { %s2283_s24 = scalar_select %p1896_p5, 1, 0 }
   0xe   : > { %p1567_p6 = pneg %p1896_p5  ;;  %s1675_s5 = scalar_lea.hbm %s2273_s1, 6144 }
   0xf   : > { %p1676_p8 = scmp.ne.s32.totalorder %s2273_s1, %s1675_s5  ;;  %p1682_p12 = scmp.lt.u32.totalorder %s1675_s5, %s2273_s1 }
  0x10   : > { %p1904_p7 = pnand %p1567_p6, %p1884_p1 }
  0x12   : > { %p1677_p9 = pneg %p1904_p7 }
  0x14   : > { %p1678_p10 = pnand %p1677_p9, %p1676_p8 }
  0x16   : > { %p1679_p11 = pneg %p1678_p10 }
  0x18   : > { %p1684_p13 = pnand %p1682_p12, %p1679_p11 }
  0x1a   : > { %1687 = shalt.err (!%p1684_p13)
}
  0x1b   : > { %s1688_s10 = scalar_lea.vmem %s171_s26, 6144  ;;  %p1696_p6 = scmp.lt.s32.totalorder %s171_s26, %s171_s26 }
  0x1c   : > { %p1689_p0 = scmp.ne.s32.totalorder %s171_s26, %s1688_s10  ;;  %p1697_p1 = scmp.lt.s32.totalorder %s1688_s10, %s1688_s10 }
  0x1e   : > { %p1691_p2 = pnand %p1689_p0, %p1677_p9  ;;  %p1698_p4 = por %p1697_p1, %p1696_p6 }
  0x20   : > { %p1692_p3 = pneg %p1691_p2 }
  0x22   : > { %p1699_p5 = pnand %p1698_p4, %p1692_p3 }
  0x24   : > { %1702 = shalt.err (!%p1699_p5)
}
  0x25   : > { %s1820_s11 = smov 384   ;;  %s1821_s12 = smov 24  }
  0x26   : > { %1570 = dma.hbm_to_vmem [thread:$0]  (!%p1904_p7), %s2273_s1, 6144, %s171_s26, [#allocation7], %s1820_s11, %s1820_s11, %s1821_s12  }
  0x27   : > { %p29_p1 = scmp.ge.s32.totalorder %s28_s28, 2  ;;  %s40_s15 = sadd.s32 1, %s1805_s17 }
  0x28   : > { %p47_p4 = scmp.ne.s32.totalorder %s1805_s17, %s1801_s16  ;;  %p48_p5 = scmp.eq.s32.totalorder %s1817_s20, 0 }
  0x29   : > { %s2296_s28 = smov (%p29_p1, %s28_s28), 0  ;;  %p1576_p9 = scmp.lt.s32.totalorder %s1817_s20, 2 }
  0x2a   : > { %p49_p8 = por %p48_p5, %p47_p4  ;;  %s35_s25 = ssub.s32 %s1813_s19, %s2296_s28 }
  0x2b   : > { %s194_s29 = sand.u32 1, %s1805_s17   ;;  %p38_p10 = scmp.eq.s32.totalorder %s35_s25, 0 }
  0x2c   : > { %s1554_s27 = smul.u32 96, %s194_s29  ;;  %p1938_p11 = pnand %p1576_p9, %p49_p8 }
  0x2d   : > { %s1943_s26 = scalar_select %p38_p10, %s1805_s17, %s40_s15  }
  0x2e   : > { %s1555_s5 = smul.u32 1536, %s1813_s19  ;;  %s198_s6 = scalar_lea.vmem [#allocation3], %s1554_s27 }
  0x2f   : > { %s208_s7 = sshll.u32 %s198_s6, 4  ;;  %s1953_s13 = scalar_lea.sflag [#allocation4], %s194_s29  ;;  %s1951_s7 = int_to_ptr.vmem [resolvable:$true] %s208_s7 }
  0x30   : > { %s1949_s10 = scalar_lea.hbm %s2272_s0, %s1555_s5  ;;  %p1705_p12 = pneg %p1938_p11 }
  0x31   : > { %s1703_s14 = scalar_lea.hbm %s1949_s10, 1536  ;;  %s1708_s27 = scalar_lea.hbm %s2272_s0, 3072 }
  0x32   : > { %p1704_p7 = scmp.ne.s32.totalorder %s1949_s10, %s1703_s14  ;;  %p1709_p2 = scmp.lt.u32.totalorder %s1949_s10, %s2272_s0 }
  0x33   : > { %p1710_p3 = scmp.lt.u32.totalorder %s1708_s27, %s1703_s14  ;;  %p1712_p1 = scmp.lt.u32.totalorder %s1703_s14, %s1949_s10 }
  0x34   : > { %p1706_p13 = pnand %p1705_p12, %p1704_p7 }
  0x35   : > { %p1711_p6 = por %p1710_p3, %p1709_p2 }
  0x36   : > { %p1707_p0 = pneg %p1706_p13 }
  0x37   : > { %p1713_p4 = por %p1712_p1, %p1711_p6 }
  0x39   : > { %p1714_p5 = pnand %p1713_p4, %p1707_p0 }
  0x3b   : > { %1717 = shalt.err (!%p1714_p5)
}
  0x3c   : > { %s1718_s29 = scalar_lea.vmem %s1951_s7, 1536  ;;  %s1822_s8 = smov [#allocation3]  }
  0x3d   : > { %p1719_p8 = scmp.ne.s32.totalorder %s1951_s7, %s1718_s29  ;;  %s1723_s9 = sshll.u32 %s1822_s8, 4  ;;  %s1724_s9 = int_to_ptr.vmem [resolvable:$false] %s1723_s9 }
  0x3e   : > { %s1725_s15 = scalar_lea.vmem %s1724_s9, 3072  ;;  %p1726_p7 = scmp.lt.s32.totalorder %s1951_s7, %s1724_s9 }
  0x3f   : > { %p1721_p9 = pnand %p1719_p8, %p1705_p12  ;;  %p1727_p13 = scmp.lt.s32.totalorder %s1725_s15, %s1718_s29 }
  0x41   : > { %p1722_p10 = pneg %p1721_p9  ;;  %p1728_p2 = por %p1727_p13, %p1726_p7 }
  0x43   : > { %p1729_p3 = pnand %p1728_p2, %p1722_p10 }
  0x45   : > { %1732 = shalt.err (!%p1729_p3)
}
  0x46   : > { %1574 = dma.hbm_to_vmem [thread:$0]  (!%p1938_p11), %s1949_s10, 1536, %s1951_s7, %s1953_s13, %s1820_s11, %s1820_s11, %s1821_s12  }
  0x47   : > { %p2286_p12 = scmp.ne.s32.totalorder %s2283_s24, 0 }
  0x48   : > { %s222_s14 = sand.u32 (!%p2286_p12), 1, %s1801_s16   ;;  %p2287_p0 = scmp.ne.s32.totalorder (!%p2286_p12), %s2282_s23, 0 }
  0x49   : > { %220 = sbr.rel (%p2286_p12) target bundleno = 1198 (0x4ae), region = 36  ;;  %s223_s27 = scalar_lea.sflag (!%p2286_p12), [#allocation4], %s222_s14 }
  0x4a   : > { %s1556_s25 = smul.u32 (!%p2286_p12), 96, %s222_s14 }
  0x4c   : > { %s1987_s5 = scalar_lea.vmem (!%p2286_p12), [#allocation3], %s1556_s25 }
  0x50   : > { %1784 = dma.done.wait (%p2287_p0), %s223_s27, 1536  }
  0x51   : > { %1786 = vsyncadd (%p2287_p0), %s223_s27, 4294965760  ;;  %p2288_p6 = scmp.ne.s32.totalorder %s2281_s22, 0 }
  0x53   : > { %1788 = dma.done.wait (%p2288_p6), [#allocation7], 6144  }
  0x54   : > { %1790 = vsyncadd (%p2288_p6), [#allocation7], 4294961152  ;;  %p1098_p11 = scmp.ne.s32.totalorder %s1809_s18, 0 }
  0x55   : > { %v263_v0 = vld [vmem:[%s2275_s3] sm:$0xff] (!%p1098_p11) }
  0x56   : > { %262 = sbr.rel (%p1098_p11) target bundleno = 93 (0x5d), region = 48  ;;  %264 = vst [vmem:[#allocation2] sm:$0xff] (!%p1098_p11), %v263_v0 }
  0x5d PF: > { %v266_v1 = vld [vmem:[#allocation6 + $0x8] sm:$0xff]  ;;  %v269_v2 = vld [vmem:[#allocation6 + $0x20] sm:$0xff]  ;;  %v268_v5 = vld [vmem:[#allocation6 + $0x18] sm:$0xff]  ;;  %v1823_v8 = vmov 0.0|0.0   ;;  %v1824_v9 = vmov 0.0   ;;  %vm1825_vm0 = vmmov 0  }
  0x5e   : > { %v265_v3 = vld [vmem:[#allocation6] sm:$0xff]  ;;  %v2001_v4 = vpack.c.bf16 %v269_v2, %v266_v1  ;;  %v272_v6 = vld [vmem:[#allocation6 + $0x38] sm:$0xff]  ;;  %v275_v7 = vld [vmem:[#allocation6 + $0x50] sm:$0xff]  ;;  %1362 = vmatprep.subr.bf16.mxu1 %v1823_v8  ;;  %385 = vmatprep.mubr.f32.mxu0 %v1824_v9  ;;  %p1117_p1 = scmp.ne.s32.totalorder %s1809_s18, 1 }
  0x5f   : > { %v2005_v10 = vpack.c.bf16 %v268_v5, %v265_v3  ;;  %v2007_v11 = vpack.c.bf16 %v275_v7, %v272_v6  ;;  %v271_v12 = vld [vmem:[#allocation6 + $0x30] sm:$0xff]  ;;  %v274_v13 = vld [vmem:[#allocation6 + $0x48] sm:$0xff]  ;;  %1222 = vmatprep.mubr.msk.f32.mxu1 %vm1825_vm0, %v1824_v9  ;;  %v281_v15 = vld [vmem:[#allocation6 + $0x80] sm:$0xff] }
  0x60   : > { %v278_v14 = vld [vmem:[#allocation6 + $0x68] sm:$0xff]  ;;  %1331 = vmatprep.subr.bf16.mxu0 %v2001_v4  ;;  %v2013_v16 = vpack.c.bf16 %v274_v13, %v271_v12  ;;  %v277_v18 = vld [vmem:[#allocation6 + $0x60] sm:$0xff]  ;;  %v280_v19 = vld [vmem:[#allocation6 + $0x78] sm:$0xff] }
  0x61   : > { %1333 = vmatpush1.bf16.msra.mxu0 %v2005_v10  ;;  %v2016_v17 = vpack.c.bf16 %v281_v15, %v278_v14  ;;  %v284_v20 = vld [vmem:[#allocation6 + $0x98] sm:$0xff]  ;;  %v287_v21 = vld [vmem:[#allocation6 + $0xb0] sm:$0xff]  ;;  %v2019_v22 = vpack.c.bf16 %v280_v19, %v277_v18  ;;  %v286_v25 = vld [vmem:[#allocation6 + $0xa8] sm:$0xff] }
  0x62   : > { %1335 = vmatprep.subr.bf16.mxu0 %v2007_v11  ;;  %v283_v23 = vld [vmem:[#allocation6 + $0x90] sm:$0xff]  ;;  %v2022_v24 = vpack.c.bf16 %v287_v21, %v284_v20  ;;  %v270_v27 = vld [vmem:[#allocation6 + $0x28] sm:$0xff]  ;;  %v293_v29 = vld [vmem:[#allocation6 + $0xe0] sm:$0xff] }
  0x63   : > { %v267_v26 = vld [vmem:[#allocation6 + $0x10] sm:$0xff]  ;;  %v290_v28 = vld [vmem:[#allocation6 + $0xc8] sm:$0xff]  ;;  %v273_v31 = vld [vmem:[#allocation6 + $0x40] sm:$0xff]  ;;  %v2027_v33 = vpack.c.bf16 %v286_v25, %v283_v23 }
  0x64   : > { %v2024_v30 = vpack.c.bf16 %v270_v27, %v267_v26  ;;  %v276_v32 = vld [vmem:[#allocation6 + $0x58] sm:$0xff]  ;;  %v289_v34 = vld [vmem:[#allocation6 + $0xc0] sm:$0xff]  ;;  %v2033_v36 = vpack.c.bf16 %v293_v29, %v290_v28  ;;  %v279_v38 = vld [vmem:[#allocation6 + $0x70] sm:$0xff] }
  0x65   : > { %1337 = vmatpush1.bf16.msra.mxu0 %v2013_v16  ;;  %v2030_v35 = vpack.c.bf16 %v276_v32, %v273_v31  ;;  %v292_v37 = vld [vmem:[#allocation6 + $0xd8] sm:$0xff]  ;;  %v282_v39 = vld [vmem:[#allocation6 + $0x88] sm:$0xff]  ;;  %v299_v41 = vld [vmem:[#allocation6 + $0x110] sm:$0xff] }
  0x66   : > { %1339 = vmatprep.subr.bf16.mxu0 %v2016_v17  ;;  %1364 = vmatpush3.bf16.msra.mxu1 %v2024_v30  ;;  %v296_v40 = vld [vmem:[#allocation6 + $0xf8] sm:$0xff]  ;;  %v2037_v42 = vpack.c.bf16 %v292_v37, %v289_v34  ;;  %v295_v43 = vld [vmem:[#allocation6 + $0xf0] sm:$0xff]  ;;  %v2040_v44 = vpack.c.bf16 %v282_v39, %v279_v38  ;;  %v298_v46 = vld [vmem:[#allocation6 + $0x108] sm:$0xff] }
  0x67   : > { %1365 = vmatprep.subr.bf16.mxu1 %v1823_v8  ;;  %v2043_v45 = vpack.c.bf16 %v299_v41, %v296_v40  ;;  %v285_v47 = vld [vmem:[#allocation6 + $0xa0] sm:$0xff]  ;;  %v288_v48 = vld [vmem:[#allocation6 + $0xb8] sm:$0xff]  ;;  %v302_v49 = vld [vmem:[#allocation6 + $0x128] sm:$0xff]  ;;  %v2047_v51 = vpack.c.bf16 %v298_v46, %v295_v43 }
  0x68   : > { %v305_v50 = vld [vmem:[#allocation6 + $0x140] sm:$0xff]  ;;  %v2050_v53 = vpack.c.bf16 %v288_v48, %v285_v47  ;;  %v304_v55 = vld [vmem:[#allocation6 + $0x138] sm:$0xff]  ;;  %v291_v56 = vld [vmem:[#allocation6 + $0xd0] sm:$0xff] }
  0x69   : > { %1341 = vmatpush1.bf16.msra.mxu0 %v2019_v22  ;;  %v301_v52 = vld [vmem:[#allocation6 + $0x120] sm:$0xff]  ;;  %v2053_v54 = vpack.c.bf16 %v305_v50, %v302_v49  ;;  %v294_v57 = vld [vmem:[#allocation6 + $0xe8] sm:$0xff]  ;;  %v308_v58 = vld [vmem:[#allocation6 + $0x158] sm:$0xff] }
  0x6a   : > { %1343 = vmatprep.subr.bf16.mxu0 %v2022_v24  ;;  %1367 = vmatpush3.bf16.msra.mxu1 %v2030_v35  ;;  %v311_v59 = vld [vmem:[#allocation6 + $0x170] sm:$0xff]  ;;  %v2057_v60 = vpack.c.bf16 %v304_v55, %v301_v52  ;;  %v2060_v62 = vpack.c.bf16 %v294_v57, %v291_v56  ;;  %v310_v0 = vld [vmem:[#allocation6 + $0x168] sm:$0xff]  ;;  %v297_v1 = vld [vmem:[#allocation6 + $0x100] sm:$0xff] }
  0x6b   : > { %1368 = vmatprep.subr.bf16.mxu1 %v1823_v8  ;;  %v307_v61 = vld [vmem:[#allocation6 + $0x150] sm:$0xff]  ;;  %v2063_v63 = vpack.c.bf16 %v311_v59, %v308_v58  ;;  %v300_v2 = vld [vmem:[#allocation6 + $0x118] sm:$0xff]  ;;  %v306_v7 = vld [vmem:[#allocation6 + $0x148] sm:$0xff] }
  0x6c   : > { %v2067_v3 = vpack.c.bf16 %v310_v0, %v307_v61  ;;  %v2070_v5 = vpack.c.bf16 %v300_v2, %v297_v1  ;;  %v303_v6 = vld [vmem:[#allocation6 + $0x130] sm:$0xff]  ;;  %v2075_v12 = vld [vmem:[#allocation2] sm:$0xff]  ;;  %v309_v14 = vld [vmem:[#allocation6 + $0x160] sm:$0xff] }
  0x6d   : > { %1345 = vmatpush1.bf16.msra.mxu0 %v2027_v33  ;;  %v2078_v13 = vpack.c.bf16 %v306_v7, %v303_v6  ;;  %v312_v15 = vld [vmem:[#allocation6 + $0x178] sm:$0xff]  ;;  %v462_v19 = vld [vmem:[%s1987_s5] sm:$0xff]  ;;  %v470_v26 = vld [vmem:[%s1987_s5 + $0x8] sm:$0xff] }
  0x6e   : > { %1347 = vmatprep.subr.bf16.mxu0 %v2033_v36  ;;  %1370 = vmatpush3.bf16.msra.mxu1 %v2040_v44  ;;  %v2084_v18 = vpack.c.bf16 %v312_v15, %v309_v14  ;;  %v2130_v37 = vld [vmem:[%s2274_s2] ss:$0 sm:$0xff]  ;;  %v478_v41 = vld [vmem:[%s1987_s5 + $0x10] sm:$0xff]  ;;  %v1104_v2 = vld [vmem:[%s1987_s5 + $0x20] sm:$0xff] }
  0x6f   : > { %1371 = vmatprep.subr.bf16.mxu1 %v1823_v8  ;;  %v1102_v56 = vld [vmem:[%s1987_s5 + $0x18] sm:$0xff] }
  0x71   : > { %1349 = vmatpush1.bf16.msra.mxu0 %v2037_v42 }
  0x72   : > { %1351 = vmatprep.subr.bf16.mxu0 %v2043_v45  ;;  %1373 = vmatpush3.bf16.msra.mxu1 %v2050_v53 }
  0x73   : > { %1374 = vmatprep.subr.bf16.mxu1 %v1823_v8 }
  0x75   : > { %1353 = vmatpush1.bf16.msra.mxu0 %v2047_v51 }
  0x76   : > { %1355 = vmatprep.subr.bf16.mxu0 %v2053_v54  ;;  %1376 = vmatpush3.bf16.msra.mxu1 %v2060_v62 }
  0x77   : > { %1377 = vmatprep.subr.bf16.mxu1 %v1823_v8 }
  0x79   : > { %1357 = vmatpush1.bf16.msra.mxu0 %v2057_v60 }
  0x7a   : > { %1359 = vmatprep.subr.bf16.mxu0 %v2063_v63  ;;  %1379 = vmatpush3.bf16.msra.mxu1 %v2070_v5 }
  0x7b   : > { %1380 = vmatprep.subr.bf16.mxu1 %v1823_v8 }
  0x7d   : > { %1361 = vmatpush1.bf16.msra.mxu0 %v2067_v3 }
  0x7e   : > { %1387 = vmatprep.subr.bf16.mxu0 %v2001_v4  ;;  %1382 = vmatpush3.bf16.msra.mxu1 %v2078_v13 }
  0x7f   : > { %1383 = vmatprep.subr.bf16.mxu1 %v1823_v8 }
  0x80   : > { %386 = vmatmul.mubr.f32.vlgmr.msra.gmra.mrb[0].mxu0 %v2075_v12 }
  0x81   : > { %1389 = vmatpush1.bf16.msra.mxu0 %v2005_v10  ;;  %550 = vmatprep.mubr.f32.mxu0 %v1824_v9 }
  0x82   : > { %1391 = vmatprep.subr.bf16.mxu0 %v2007_v11  ;;  %1385 = vmatpush3.bf16.msra.mxu1 %v2084_v18 }
  0x83   : > { %1418 = vmatprep.subr.bf16.mxu1 %v1823_v8 }
  0x85   : > { %1393 = vmatpush1.bf16.msra.mxu0 %v2013_v16  ;;  %1223 = vmatmul.mubr.f32.vlgmr.msra.gmra.mrb[0].mxu1 %v2075_v12 }
  0x86   : > { %1395 = vmatprep.subr.bf16.mxu0 %v2016_v17  ;;  %1420 = vmatpush3.bf16.msra.mxu1 %v2024_v30 }
  0x87   : > { %1421 = vmatprep.subr.bf16.mxu1 %v1823_v8  ;;  %1257 = vmatprep.mubr.msk.f32.mxu1 %vm1825_vm0, %v1824_v9 }
  0x89   : > { %1397 = vmatpush1.bf16.msra.mxu0 %v2019_v22 }
  0x8a   : > { %1399 = vmatprep.subr.bf16.mxu0 %v2022_v24  ;;  %1423 = vmatpush3.bf16.msra.mxu1 %v2030_v35 }
  0x8b   : > { %1424 = vmatprep.subr.bf16.mxu1 %v1823_v8 }
  0x8d   : > { %1401 = vmatpush1.bf16.msra.mxu0 %v2027_v33 }
  0x8e   : > { %1403 = vmatprep.subr.bf16.mxu0 %v2033_v36  ;;  %1426 = vmatpush3.bf16.msra.mxu1 %v2040_v44 }
  0x8f   : > { %1427 = vmatprep.subr.bf16.mxu1 %v1823_v8 }
  0x91   : > { %1405 = vmatpush1.bf16.msra.mxu0 %v2037_v42 }
  0x92   : > { %1407 = vmatprep.subr.bf16.mxu0 %v2043_v45  ;;  %1429 = vmatpush3.bf16.msra.mxu1 %v2050_v53 }
  0x93   : > { %1430 = vmatprep.subr.bf16.mxu1 %v1823_v8 }
  0x95   : > { %1409 = vmatpush1.bf16.msra.mxu0 %v2047_v51 }
  0x96   : > { %1411 = vmatprep.subr.bf16.mxu0 %v2053_v54  ;;  %1432 = vmatpush3.bf16.msra.mxu1 %v2060_v62 }
  0x97   : > { %1433 = vmatprep.subr.bf16.mxu1 %v1823_v8 }
  0x99   : > { %1413 = vmatpush1.bf16.msra.mxu0 %v2057_v60 }
  0x9a   : > { %1415 = vmatprep.subr.bf16.mxu0 %v2063_v63  ;;  %1435 = vmatpush3.bf16.msra.mxu1 %v2070_v5 }
  0x9b   : > { %1436 = vmatprep.subr.bf16.mxu1 %v1823_v8 }
  0x9d   : > { %1417 = vmatpush1.bf16.msra.mxu0 %v2067_v3 }
  0x9e   : > { %1443 = vmatprep.subr.bf16.mxu0 %v2001_v4  ;;  %1438 = vmatpush3.bf16.msra.mxu1 %v2078_v13 }
  0x9f   : > { %1439 = vmatprep.subr.bf16.mxu1 %v1823_v8 }
  0xa2   : > { %1441 = vmatpush3.bf16.msra.mxu1 %v2084_v18 }
  0xa3   : > { %1474 = vmatprep.subr.bf16.mxu1 %v1823_v8 }
 0x153   : > { %v387_v20 = vpop.f32.mrb[0].mxu0 }
 0x154   : > { %v463_v21 = vadd.f32 %v462_v19, %v387_v20  ;;  %v389_v23 = vpop.f32.mrb[1].mxu0  ;;  %v1106_v20 = vld [vmem:[%s1987_s5 + $0x28] sm:$0xff] }
 0x155   : > { %v471_v28 = vadd.f32 %v470_v26, %v389_v23 }
 0x156   : > { %v1100_v25 = vmul.f32 -1.442695, %v463_v21 }
 0x157   : > { %v1101_v31 = vmul.f32 -1.442695, %v471_v28 }
 0x158   : > { %1635 = vpow2.f32 %v1100_v25  ;;  %v458_v27 = vpop.f32.mrb[0].mxu1 }
 0x159   : > { %v1224_v29 = vpop.f32.mrb[1].mxu1  ;;  %1637 = vpow2.f32 %v1101_v31  ;;  %v479_v38 = vadd.f32 %v2130_v37, %v458_v27 }
 0x162   : > { %v1636_v32 = vpop.eup %1635 }
 0x163   : > { %v467_v34 = vadd.f32 1.0, %v1636_v32  ;;  %v1638_v39 = vpop.eup %1637 }
 0x164   : > { %v475_v46 = vadd.f32 1.0, %v1638_v39 }
 0x165   : > { %1639 = vrcp.f32 %v467_v34 }
 0x16f   : > { %v1640_v40 = vpop.eup %1639 }
 0x170   : > { %v480_v43 = vmul.f32 %v1640_v40, %v479_v38 }
 0x172   : > { %v481_v47 = vadd.f32 %v480_v43, %v478_v41  ;;  %v1114_v43 = vld [vmem:[%s1987_s5 + $0x50] sm:$0xff] }
 0x174   : > { %1641 = vtanh.f32 %v481_v47 }
 0x175   : > { %1643 = vrcp.f32 %v475_v46 }
 0x17e   : > { %v1642_v48 = vpop.eup %1641 }
 0x17f   : > { %v483_v49 = vsub.f32 %v2075_v12, %v1642_v48  ;;  %v1644_v50 = vpop.eup %1643 }
 0x181   : > { %v484_v52 = vmul.f32 %v1644_v50, %v483_v49 }
 0x183   : > { %v2135_v55 = vadd.f32 %v1642_v48, %v484_v52 }
 0x185   : > { %551 = vmatmul.mubr.f32.vlgmr.msra.gmra.mrb[2].mxu0 %v2135_v55  ;;  %1258 = vmatmul.mubr.f32.vlgmr.msra.gmra.mrb[2].mxu1 %v2135_v55 }
 0x186   : > { %1445 = vmatpush1.bf16.msra.mxu0 %v2005_v10  ;;  %1476 = vmatpush3.bf16.msra.mxu1 %v2024_v30 }
 0x187   : > { %1447 = vmatprep.subr.bf16.mxu0 %v2007_v11  ;;  %1477 = vmatprep.subr.bf16.mxu1 %v1823_v8 }
 0x188   : > { %716 = vmatprep.mubr.f32.mxu0 %v1824_v9  ;;  %1292 = vmatprep.mubr.msk.f32.mxu1 %vm1825_vm0, %v1824_v9 }
 0x18a   : > { %1449 = vmatpush1.bf16.msra.mxu0 %v2013_v16  ;;  %1479 = vmatpush3.bf16.msra.mxu1 %v2030_v35 }
 0x18b   : > { %1451 = vmatprep.subr.bf16.mxu0 %v2016_v17  ;;  %1480 = vmatprep.subr.bf16.mxu1 %v1823_v8 }
 0x18e   : > { %1453 = vmatpush1.bf16.msra.mxu0 %v2019_v22  ;;  %1482 = vmatpush3.bf16.msra.mxu1 %v2040_v44 }
 0x18f   : > { %1455 = vmatprep.subr.bf16.mxu0 %v2022_v24  ;;  %1483 = vmatprep.subr.bf16.mxu1 %v1823_v8 }
 0x192   : > { %1457 = vmatpush1.bf16.msra.mxu0 %v2027_v33  ;;  %1485 = vmatpush3.bf16.msra.mxu1 %v2050_v53 }
 0x193   : > { %1459 = vmatprep.subr.bf16.mxu0 %v2033_v36  ;;  %1486 = vmatprep.subr.bf16.mxu1 %v1823_v8 }
 0x196   : > { %1461 = vmatpush1.bf16.msra.mxu0 %v2037_v42  ;;  %1488 = vmatpush3.bf16.msra.mxu1 %v2060_v62 }
 0x197   : > { %1463 = vmatprep.subr.bf16.mxu0 %v2043_v45  ;;  %1489 = vmatprep.subr.bf16.mxu1 %v1823_v8 }
 0x19a   : > { %1465 = vmatpush1.bf16.msra.mxu0 %v2047_v51  ;;  %1491 = vmatpush3.bf16.msra.mxu1 %v2070_v5 }
 0x19b   : > { %1467 = vmatprep.subr.bf16.mxu0 %v2053_v54  ;;  %1492 = vmatprep.subr.bf16.mxu1 %v1823_v8 }
 0x19e   : > { %1469 = vmatpush1.bf16.msra.mxu0 %v2057_v60  ;;  %1494 = vmatpush3.bf16.msra.mxu1 %v2078_v13 }
 0x19f   : > { %1471 = vmatprep.subr.bf16.mxu0 %v2063_v63  ;;  %1495 = vmatprep.subr.bf16.mxu1 %v1823_v8 }
 0x1a2   : > { %1473 = vmatpush1.bf16.msra.mxu0 %v2067_v3  ;;  %1497 = vmatpush3.bf16.msra.mxu1 %v2084_v18 }
 0x1a3   : > { %1499 = vmatprep.subr.bf16.mxu0 %v2001_v4  ;;  %1530 = vmatprep.subr.bf16.mxu1 %v1823_v8 }
 0x258   : > { %v552_v57 = vpop.f32.mrb[2].mxu0  ;;  %v623_v58 = vpop.f32.mrb[2].mxu1 }
 0x259   : > { %v629_v59 = vadd.f32 %v1102_v56, %v552_v57  ;;  %v554_v61 = vpop.f32.mrb[3].mxu0  ;;  %v1259_v0 = vpop.f32.mrb[3].mxu1  ;;  %v645_v4 = vadd.f32 %v2130_v37, %v623_v58  ;;  %v1116_v56 = vld [vmem:[%s1987_s5 + $0x58] sm:$0xff] }
 0x25a   : > { %v637_v6 = vadd.f32 %v1104_v2, %v554_v61 }
 0x25b   : > { %v1103_v1 = vmul.f32 -1.442695, %v629_v59 }
 0x25c   : > { %v1105_v7 = vmul.f32 -1.442695, %v637_v6 }
 0x25d   : > { %1645 = vpow2.f32 %v1103_v1 }
 0x25e   : > { %1647 = vpow2.f32 %v1105_v7 }
 0x267   : > { %v1646_v12 = vpop.eup %1645 }
 0x268   : > { %v633_v14 = vadd.f32 1.0, %v1646_v12  ;;  %v1648_v15 = vpop.eup %1647 }
 0x269   : > { %v641_v25 = vadd.f32 1.0, %v1648_v15 }
 0x26a   : > { %1649 = vrcp.f32 %v633_v14 }
 0x274   : > { %v1650_v19 = vpop.eup %1649 }
 0x275   : > { %v646_v21 = vmul.f32 %v1650_v19, %v645_v4 }
 0x277   : > { %v647_v23 = vadd.f32 %v1106_v20, %v646_v21 }
 0x279   : > { %1651 = vtanh.f32 %v647_v23 }
 0x27a   : > { %1653 = vrcp.f32 %v641_v25 }
 0x283   : > { %v1652_v26 = vpop.eup %1651 }
 0x284   : > { %v649_v27 = vsub.f32 %v2135_v55, %v1652_v26  ;;  %v1654_v28 = vpop.eup %1653 }
 0x286   : > { %v650_v29 = vmul.f32 %v1654_v28, %v649_v27 }
 0x288   : > { %v2179_v31 = vadd.f32 %v1652_v26, %v650_v29 }
 0x28a   : > { %717 = vmatmul.mubr.f32.vlgmr.msra.gmra.mrb[4].mxu0 %v2179_v31  ;;  %1293 = vmatmul.mubr.f32.vlgmr.msra.gmra.mrb[4].mxu1 %v2179_v31 }
 0x28b   : > { %1501 = vmatpush1.bf16.msra.mxu0 %v2005_v10  ;;  %1532 = vmatpush3.bf16.msra.mxu1 %v2024_v30  ;;  %v1109_v30 = vld [vmem:[%s1987_s5 + $0x38] sm:$0xff] }
 0x28c   : > { %1503 = vmatprep.subr.bf16.mxu0 %v2007_v11  ;;  %1533 = vmatprep.subr.bf16.mxu1 %v1823_v8 }
 0x28d   : > { %882 = vmatprep.mubr.f32.mxu0 %v1824_v9  ;;  %1327 = vmatprep.mubr.msk.f32.mxu1 %vm1825_vm0, %v1824_v9  ;;  %v1107_v9 = vld [vmem:[%s1987_s5 + $0x30] sm:$0xff] }
 0x28f   : > { %1505 = vmatpush1.bf16.msra.mxu0 %v2013_v16  ;;  %1535 = vmatpush3.bf16.msra.mxu1 %v2030_v35 }
 0x290   : > { %1507 = vmatprep.subr.bf16.mxu0 %v2016_v17  ;;  %1536 = vmatprep.subr.bf16.mxu1 %v1823_v8 }
 0x293   : > { %1509 = vmatpush1.bf16.msra.mxu0 %v2019_v22  ;;  %1538 = vmatpush3.bf16.msra.mxu1 %v2040_v44 }
 0x294   : > { %1511 = vmatprep.subr.bf16.mxu0 %v2022_v24  ;;  %1539 = vmatprep.subr.bf16.mxu1 %v1823_v8 }
 0x297   : > { %1513 = vmatpush1.bf16.msra.mxu0 %v2027_v33  ;;  %1541 = vmatpush3.bf16.msra.mxu1 %v2050_v53 }
 0x298   : > { %1515 = vmatprep.subr.bf16.mxu0 %v2033_v36  ;;  %1542 = vmatprep.subr.bf16.mxu1 %v1823_v8 }
 0x29b   : > { %1517 = vmatpush1.bf16.msra.mxu0 %v2037_v42  ;;  %1544 = vmatpush3.bf16.msra.mxu1 %v2060_v62 }
 0x29c   : > { %1519 = vmatprep.subr.bf16.mxu0 %v2043_v45  ;;  %1545 = vmatprep.subr.bf16.mxu1 %v1823_v8 }
 0x29f   : > { %1521 = vmatpush1.bf16.msra.mxu0 %v2047_v51  ;;  %1547 = vmatpush3.bf16.msra.mxu1 %v2070_v5  ;;  %v1111_v51 = vld [vmem:[%s1987_s5 + $0x40] sm:$0xff] }
 0x2a0   : > { %1523 = vmatprep.subr.bf16.mxu0 %v2053_v54  ;;  %1548 = vmatprep.subr.bf16.mxu1 %v1823_v8 }
 0x2a3   : > { %1525 = vmatpush1.bf16.msra.mxu0 %v2057_v60  ;;  %1550 = vmatpush3.bf16.msra.mxu1 %v2078_v13 }
 0x2a4   : > { %1527 = vmatprep.subr.bf16.mxu0 %v2063_v63  ;;  %1551 = vmatprep.subr.bf16.mxu1 %v1823_v8 }
 0x2a7   : > { %1529 = vmatpush1.bf16.msra.mxu0 %v2067_v3  ;;  %1553 = vmatpush3.bf16.msra.mxu1 %v2084_v18  ;;  %v1112_v18 = vld [vmem:[%s1987_s5 + $0x48] sm:$0xff] }
 0x35d   : > { %v718_v10 = vpop.f32.mrb[4].mxu0  ;;  %v789_v11 = vpop.f32.mrb[4].mxu1 }
 0x35e   : > { %v795_v16 = vadd.f32 %v1107_v9, %v718_v10  ;;  %v720_v17 = vpop.f32.mrb[5].mxu0  ;;  %v1294_v22 = vpop.f32.mrb[5].mxu1  ;;  %v811_v44 = vadd.f32 %v2130_v37, %v789_v11 }
 0x35f   : > { %v803_v33 = vadd.f32 %v1109_v30, %v720_v17 }
 0x360   : > { %v1108_v24 = vmul.f32 -1.442695, %v795_v16 }
 0x361   : > { %v1110_v35 = vmul.f32 -1.442695, %v803_v33 }
 0x362   : > { %1655 = vpow2.f32 %v1108_v24 }
 0x363   : > { %1657 = vpow2.f32 %v1110_v35 }
 0x36c   : > { %v1656_v36 = vpop.eup %1655 }
 0x36d   : > { %v799_v42 = vadd.f32 1.0, %v1656_v36  ;;  %v1658_v8 = vpop.eup %1657 }
 0x36e   : > { %v807_v60 = vadd.f32 1.0, %v1658_v8 }
 0x36f   : > { %1659 = vrcp.f32 %v799_v42 }
 0x379   : > { %v1660_v45 = vpop.eup %1659 }
 0x37a   : > { %v812_v53 = vmul.f32 %v1660_v45, %v811_v44 }
 0x37c   : > { %v813_v54 = vadd.f32 %v1111_v51, %v812_v53 }
 0x37e   : > { %1661 = vtanh.f32 %v813_v54 }
 0x37f   : > { %1663 = vrcp.f32 %v807_v60 }
 0x388   : > { %v1662_v62 = vpop.eup %1661 }
 0x389   : > { %v815_v63 = vsub.f32 %v2179_v31, %v1662_v62  ;;  %v1664_v3 = vpop.eup %1663 }
 0x38b   : > { %v816_v5 = vmul.f32 %v1664_v3, %v815_v63 }
 0x38d   : > { %v817_v13 = vadd.f32 %v1662_v62, %v816_v5 }
 0x38f   : > { %883 = vmatmul.mubr.f32.vlgmr.msra.gmra.mrb[6].mxu0 %v817_v13  ;;  %1328 = vmatmul.mubr.f32.vlgmr.msra.gmra.mrb[6].mxu1 %v817_v13 }
 0x462   : > { %v884_v32 = vpop.f32.mrb[6].mxu0  ;;  %v955_v34 = vpop.f32.mrb[6].mxu1 }
 0x463   : > { %v961_v38 = vadd.f32 %v1112_v18, %v884_v32  ;;  %v886_v39 = vpop.f32.mrb[7].mxu0  ;;  %v1329_v40 = vpop.f32.mrb[7].mxu1  ;;  %v977_v52 = vadd.f32 %v2130_v37, %v955_v34 }
 0x464   : > { %v969_v46 = vadd.f32 %v1114_v43, %v886_v39 }
 0x465   : > { %v1113_v41 = vmul.f32 -1.442695, %v961_v38 }
 0x466   : > { %v1115_v47 = vmul.f32 -1.442695, %v969_v46 }
 0x467   : > { %1665 = vpow2.f32 %v1113_v41 }
 0x468   : > { %1667 = vpow2.f32 %v1115_v47 }
 0x471   : > { %v1666_v48 = vpop.eup %1665 }
 0x472   : > { %v965_v49 = vadd.f32 1.0, %v1666_v48  ;;  %v1668_v50 = vpop.eup %1667 }
 0x473   : > { %v973_v59 = vadd.f32 1.0, %v1668_v50 }
 0x474   : > { %1669 = vrcp.f32 %v965_v49 }
 0x47e   : > { %v1670_v55 = vpop.eup %1669 }
 0x47f   : > { %v978_v57 = vmul.f32 %v1670_v55, %v977_v52 }
 0x481   : > { %v979_v58 = vadd.f32 %v1116_v56, %v978_v57 }
 0x483   : > { %1671 = vtanh.f32 %v979_v58 }
 0x484   : > { %1673 = vrcp.f32 %v973_v59 }
 0x48d   : > { %v1672_v61 = vpop.eup %1671 }
 0x48e   : > { %v981_v0 = vsub.f32 %v817_v13, %v1672_v61  ;;  %v1674_v1 = vpop.eup %1673  ;;  %988 = sbr.rel (%p1117_p1) target bundleno = 1173 (0x495), region = 52 }
 0x490   : > { %v982_v2 = vmul.f32 %v1674_v1, %v981_v0 }
 0x492   : > { %v983_v6 = vadd.f32 %v1672_v61, %v982_v2 }
 0x494   : > { %984 = vst [vmem:[#allocation2] sm:$0xff] %v983_v6  ;;  %989 = vst [vmem:[#allocation8] sm:$0xff] (!%p1117_p1), %v983_v6 }
 0x495 PF: > { %p2228_p4 = scmp.eq.s32.totalorder %s1088_s21, 1  ;;  %s1826_s30 = smov [#allocation8]  }
 0x496   : > { %s999_s7 = sshll.u32 %s1826_s30, 4  ;;  %s1000_s7 = int_to_ptr.vmem [resolvable:$true] %s999_s7 }
 0x497   : > { %s1733_s10 = scalar_lea.vmem %s1000_s7, 128  ;;  %p1740_p10 = scmp.lt.s32.totalorder %s1000_s7, %s1000_s7 }
 0x498   : > { %p1734_p5 = scmp.ne.s32.totalorder %s1000_s7, %s1733_s10  ;;  %p1741_p7 = scmp.lt.s32.totalorder %s1733_s10, %s1733_s10 }
 0x49a   : > { %p1735_p8 = pnand %p1734_p5, %p2228_p4  ;;  %p1742_p13 = por %p1741_p7, %p1740_p10 }
 0x49c   : > { %p1736_p9 = pneg %p1735_p8 }
 0x49e   : > { %p1743_p2 = pnand %p1742_p13, %p1736_p9 }
 0x4a0   : > { %1746 = shalt.err (!%p1743_p2)
}
 0x4a1   : > { %s1747_s21 = scalar_lea.hbm %s2276_s4, 128 }
 0x4a2   : > { %p1748_p3 = scmp.ne.s32.totalorder %s2276_s4, %s1747_s21  ;;  %p1753_p6 = scmp.lt.u32.totalorder %s1747_s21, %s2276_s4 }
 0x4a4   : > { %p1749_p12 = pnand %p1748_p3, %p2228_p4 }
 0x4a6   : > { %p1750_p0 = pneg %p1749_p12 }
 0x4a8   : > { %p1755_p11 = pnand %p1753_p6, %p1750_p0 }
 0x4aa   : > { %1758 = shalt.err (!%p1755_p11)
}
 0x4ab   : > { %1564 = dma.vmem_to_hbm [thread:$0]  (%p2228_p4), %s1000_s7, 128, %s2276_s4, [#allocation5]  }
 0x4ac   : > { %1792 = dma.done.wait (%p2228_p4), [#allocation5], 128  }
 0x4ad   : > { %1794 = vsyncadd (%p2228_p4), [#allocation5], 4294967168 }
 0x4ae PF: > { %s19_s20 = sadd.s32 1, %s1817_s20   ;;  %s2290_s15 = smov %s1801_s16 }
 0x4af   : > { %p16_p1 = scmp.ge.s32.totalorder %s19_s20, 4   ;;  %s2291_s16 = smov %s1805_s17 }
 0x4b0   : > { %s2292_s17 = smov %s1943_s26  ;;  %s2293_s18 = smov %s1813_s19 }
 0x4b1   : > { %s2294_s19 = smov %s2296_s28  ;;  %18 = sbr.rel (!%p16_p1) target bundleno = 6 (0x6), region = 92 }
 0x4b8   :  { %1012 = vsyncpa [#allocation4], 1 }
 0x4b9   :  { %1014 = vsyncpa [#allocation4 + $0x1], 1 }
 0x4ba   :  { %1015 = vsyncpa [#allocation7], 1 }
 0x4bb   :  { %1016 = vsyncpa [#allocation5], 1 }
 0x4bc   :  { %1018 = vsyncpa [#allocation5 + $0x1], 1 }

</bundles_post_ra>
